<compile_context>
chip_gen: v7x
topology: tpu7x:2x2x1
jax: 0.10.0
libtpu: 0.0.40
codegen_flags: <defaults>
</compile_context>

<pallas_src>
import jax
import jax.numpy as jnp
from jax.experimental import pallas as pl
from jax.experimental.pallas import tpu as pltpu


# ----------------------------------------------------------------------------
# Kernel 1: fused conditioning MLPs (one call, gridded over batch).
#   h     = relu(y @ [w1g | w1b] + [b1g | b1b])      (tb, 512)
#   gamma = h[:, :256] @ w2g + b2g                   (tb, C)
#   beta  = h[:, 256:] @ w2b + b2b                   (tb, C)
# ----------------------------------------------------------------------------
def _mlp_kernel(y_ref, w1_ref, b1_ref, w2g_ref, b2g_ref, w2b_ref, b2b_ref,
                gamma_ref, beta_ref):
    h = jnp.dot(y_ref[...], w1_ref[...], preferred_element_type=jnp.float32)
    h = jnp.maximum(h + b1_ref[...], 0.0)
    hg = h[:, :256]     # lane-aligned (128-multiple) slices of the fused hidden
    hb = h[:, 256:]
    gamma = jnp.dot(hg, w2g_ref[...], preferred_element_type=jnp.float32) + b2g_ref[...]
    beta = jnp.dot(hb, w2b_ref[...], preferred_element_type=jnp.float32) + b2b_ref[...]
    gamma_ref[...] = gamma.astype(gamma_ref.dtype)
    beta_ref[...] = beta.astype(beta_ref.dtype)


def _run_mlps(y, params):
    B = y.shape[0]
    C = params["w2g"].shape[1]

    # Grid over batch so y/h/outputs never have to co-reside in VMEM for huge
    # B; weights use constant index_maps (stay resident, DMAed once).
    tb = B if B <= 256 else 256
    grid = (pl.cdiv(B, tb),)

    gamma, beta = pl.pallas_call(
        _mlp_kernel,
        out_shape=(jax.ShapeDtypeStruct((B, C), jnp.float32),
                   jax.ShapeDtypeStruct((B, C), jnp.float32)),
        grid_spec=pltpu.PrefetchScalarGridSpec(
            num_scalar_prefetch=0,
            grid=grid,
            in_specs=[
                pl.BlockSpec((tb, 256), lambda i: (i, 0)),    # y batch tile
                pl.BlockSpec((256, 512), lambda i: (0, 0)),   # fused layer-1 W
                pl.BlockSpec((1, 512), lambda i: (0, 0)),     # fused layer-1 b
                pl.BlockSpec((256, C), lambda i: (0, 0)),     # w2 gamma
                pl.BlockSpec((1, C), lambda i: (0, 0)),       # b2 gamma
                pl.BlockSpec((256, C), lambda i: (0, 0)),     # w2 beta
                pl.BlockSpec((1, C), lambda i: (0, 0)),       # b2 beta
            ],
            out_specs=[pl.BlockSpec((tb, C), lambda i: (i, 0)),
                       pl.BlockSpec((tb, C), lambda i: (i, 0))],
        ),
        compiler_params=pltpu.CompilerParams(
            dimension_semantics=("parallel",)),
    )(y, params["w1c"], params["b1c"],
      params["w2g"], params["b2g"], params["w2b"], params["b2b"])
    return gamma, beta


# ----------------------------------------------------------------------------
# Kernel 2: per-(batch, channel) affine transform of the feature map.
#   out[bc, hw] = gamma[bc] * x[bc, hw] + beta[bc]
# Fixed tiles + cdiv grid (partial blocks masked), auto-pipelined BlockSpecs.
# ----------------------------------------------------------------------------
def _affine_apply_kernel(x_ref, g_ref, b_ref, o_ref):
    o_ref[...] = (g_ref[...] * x_ref[...] + b_ref[...]).astype(o_ref.dtype)


def _apply_affine(x, gamma, beta):
    B, C, H, W = x.shape
    BC, HW = B * C, H * W
    x2 = x.reshape(BC, HW)
    g2 = gamma.astype(jnp.float32).reshape(BC, 1)
    b2 = beta.astype(jnp.float32).reshape(BC, 1)

    itemsize = jnp.dtype(x.dtype).itemsize
    sub_unit = max(8, 32 // itemsize)   # 8 for f32, 16 for bf16, 32 for int8/fp8
    lane_unit = 128

    # Fixed tile shapes; cdiv grid masks any ragged last block, so tile size
    # stays bounded for arbitrary (B, C, H, W).
    if BC <= 256:
        tbc = BC                         # equals full dim -> no alignment needed
    else:
        tbc = 256                        # multiple of sub_unit for all dtypes
        tbc -= tbc % sub_unit

    block_budget = 4 << 20               # ~4 MiB per block (x and out each)
    max_thw = max(lane_unit, block_budget // max(1, tbc * itemsize))
    if HW <= max_thw:
        thw = HW                          # full row (equals full dim)
    else:
        thw = max(lane_unit, (max_thw // lane_unit) * lane_unit)

    grid = (pl.cdiv(BC, tbc), pl.cdiv(HW, thw))

    out2 = pl.pallas_call(
        _affine_apply_kernel,
        out_shape=jax.ShapeDtypeStruct((BC, HW), x.dtype),
        grid_spec=pltpu.PrefetchScalarGridSpec(
            num_scalar_prefetch=0,
            grid=grid,
            in_specs=[
                pl.BlockSpec((tbc, thw), lambda i, j: (i, j)),  # x tile
                pl.BlockSpec((tbc, 1), lambda i, j: (i, 0)),    # gamma per-bc
                pl.BlockSpec((tbc, 1), lambda i, j: (i, 0)),    # beta per-bc
            ],
            out_specs=pl.BlockSpec((tbc, thw), lambda i, j: (i, j)),
        ),
        compiler_params=pltpu.CompilerParams(
            dimension_semantics=("parallel", "parallel"),
            # ~16 MiB double-buffered at 4 MiB blocks; 48 MiB limit fits v7x's
            # 64 MiB physical VMEM and overrides v5e's 16 MiB scoped default.
            vmem_limit_bytes=48 << 20),
    )(x2, g2, b2)
    return out2.reshape(B, C, H, W)


# ----------------------------------------------------------------------------
# Parameter construction (deterministic), mirroring affine.__init__/_initialize:
#   linear1 weights/biases: random (default torch init replaced by a fixed key)
#   fc_gamma.linear2: weight = 0, bias = 1
#   fc_beta.linear2 : weight = 0, bias = 0
# Weights stored transposed: (in_features, out_features).  The fused layer-1
# weight/bias (w1c/b1c) are precomputed here ONCE, not per forward call.
# ----------------------------------------------------------------------------
def init_affine_params(num_features, key):
    k1, k2, k3, k4 = jax.random.split(key, 4)
    scale = 1.0 / jnp.sqrt(256.0)
    w1g = jax.random.uniform(k1, (256, 256), jnp.float32, -scale, scale)
    b1g = jax.random.uniform(k2, (1, 256), jnp.float32, -scale, scale)
    w1b = jax.random.uniform(k3, (256, 256), jnp.float32, -scale, scale)
    b1b = jax.random.uniform(k4, (1, 256), jnp.float32, -scale, scale)
    params = {
        # raw (for reference path)
        "w1g": w1g, "b1g": b1g, "w1b": w1b, "b1b": b1b,
        "w2g": jnp.zeros((256, num_features), jnp.float32),
        "b2g": jnp.ones((1, num_features), jnp.float32),
        "w2b": jnp.zeros((256, num_features), jnp.float32),
        "b2b": jnp.zeros((1, num_features), jnp.float32),
        # fused layer-1 (hoisted out of the forward pass)
        "w1c": jnp.concatenate([w1g, w1b], axis=1),    # (256, 512)
        "b1c": jnp.concatenate([b1g, b1b], axis=1),    # (1, 512)
    }
    return params


def affine_forward(params, x, y):
    """x: (B, C, H, W), y: (B, 256) float32 -> (B, C, H, W)."""
    gamma, beta = _run_mlps(y, params)          # (B, C), (B, C) in f32
    return _apply_affine(x, gamma, beta)        # broadcast over H, W


def affine_forward_ref(params, x, y):
    """Pure-JAX reference for correctness checking."""
    hg = jnp.maximum(y @ params["w1g"] + params["b1g"], 0.0)
    gamma = hg @ params["w2g"] + params["b2g"]
    hb = jnp.maximum(y @ params["w1b"] + params["b1b"], 0.0)
    beta = hb @ params["w2b"] + params["b2b"]
    return gamma[:, :, None, None] * x + beta[:, :, None, None]


if __name__ == "__main__":
    B, C, H, W = 2, 4, 16, 16
    key = jax.random.PRNGKey(0)
    kx, ky, kp = jax.random.split(key, 3)

    x = jax.random.normal(kx, (B, C, H, W), jnp.float32)
    y = jax.random.normal(ky, (B, 256), jnp.float32)
    params = init_affine_params(C, kp)

    out = affine_forward(params, x, y)
    out = jax.block_until_ready(out)

    ref = affine_forward_ref(params, x, y)
    assert out.shape == (B, C, H, W)
    assert jnp.allclose(out, ref, atol=1e-5, rtol=1e-5)

    print("KERNEL_OK")
</pallas_src>

<mosaic_0001>
module attributes {stable_mosaic.version = 11 : i64} {
  func.func @_mlp_kernel(%arg0: i32, %arg1: memref<2x256xf32, #tpu.memory_space<vmem>>, %arg2: memref<256x512xf32, #tpu.memory_space<vmem>>, %arg3: memref<1x512xf32, #tpu.memory_space<vmem>>, %arg4: memref<256x4xf32, #tpu.memory_space<vmem>>, %arg5: memref<1x4xf32, #tpu.memory_space<vmem>>, %arg6: memref<256x4xf32, #tpu.memory_space<vmem>>, %arg7: memref<1x4xf32, #tpu.memory_space<vmem>>, %arg8: memref<2x4xf32, #tpu.memory_space<vmem>>, %arg9: memref<2x4xf32, #tpu.memory_space<vmem>>) attributes {dimension_semantics = [#tpu.dimension_semantics<parallel>], iteration_bounds = array<i64: 1>, scalar_prefetch = 0 : i64, scratch_operands = 0 : i64, tpu.core_type = #tpu.core_type<tc>, window_params = [{transform_indices = @transform_0, window_bounds = array<i64: 2, 256>}, {pipeline_mode = #tpu.pipeline_mode<synchronous>, transform_indices = @transform_1, window_bounds = array<i64: 256, 512>}, {pipeline_mode = #tpu.pipeline_mode<synchronous>, transform_indices = @transform_2, window_bounds = array<i64: 1, 512>}, {pipeline_mode = #tpu.pipeline_mode<synchronous>, transform_indices = @transform_3, window_bounds = array<i64: 256, 4>}, {pipeline_mode = #tpu.pipeline_mode<synchronous>, transform_indices = @transform_4, window_bounds = array<i64: 1, 4>}, {pipeline_mode = #tpu.pipeline_mode<synchronous>, transform_indices = @transform_5, window_bounds = array<i64: 256, 4>}, {pipeline_mode = #tpu.pipeline_mode<synchronous>, transform_indices = @transform_6, window_bounds = array<i64: 1, 4>}, {transform_indices = @transform_7, window_bounds = array<i64: 2, 4>}, {transform_indices = @transform_8, window_bounds = array<i64: 2, 4>}]} {
    %c0 = arith.constant 0 : index
    %c0_0 = arith.constant 0 : index
    %0 = vector.load %arg1[%c0, %c0_0] : memref<2x256xf32, #tpu.memory_space<vmem>>, vector<2x256xf32>
    %c0_1 = arith.constant 0 : index
    %c0_2 = arith.constant 0 : index
    %1 = vector.load %arg2[%c0_1, %c0_2] : memref<256x512xf32, #tpu.memory_space<vmem>>, vector<256x512xf32>
    %cst = arith.constant dense<0.000000e+00> : vector<2x512xf32>
    %2 = tpu.matmul %0, %1, %cst {dimension_numbers = #tpu.dot_dimension_numbers<[1], [0], [0], [1], [0, 0, 1, 1], [], []>} : vector<2x256xf32>, vector<256x512xf32>, vector<2x512xf32> -> vector<2x512xf32>
    %c0_3 = arith.constant 0 : index
    %c0_4 = arith.constant 0 : index
    %3 = vector.load %arg3[%c0_3, %c0_4] : memref<1x512xf32, #tpu.memory_space<vmem>>, vector<1x512xf32>
    %4 = vector.broadcast %3 : vector<1x512xf32> to vector<2x512xf32>
    %5 = arith.addf %2, %4 : vector<2x512xf32>
    %cst_5 = arith.constant 0.000000e+00 : f32
    %6 = vector.broadcast %cst_5 : f32 to vector<2x512xf32>
    %7 = arith.maximumf %5, %6 : vector<2x512xf32>
    %8 = vector.extract_strided_slice %7 {offsets = [0, 0], sizes = [2, 256], strides = [1, 1]} : vector<2x512xf32> to vector<2x256xf32>
    %9 = vector.extract_strided_slice %7 {offsets = [0, 256], sizes = [2, 256], strides = [1, 1]} : vector<2x512xf32> to vector<2x256xf32>
    %c0_6 = arith.constant 0 : index
    %c0_7 = arith.constant 0 : index
    %10 = vector.load %arg4[%c0_6, %c0_7] : memref<256x4xf32, #tpu.memory_space<vmem>>, vector<256x4xf32>
    %cst_8 = arith.constant dense<0.000000e+00> : vector<2x4xf32>
    %11 = tpu.matmul %8, %10, %cst_8 {dimension_numbers = #tpu.dot_dimension_numbers<[1], [0], [0], [1], [0, 0, 1, 1], [], []>} : vector<2x256xf32>, vector<256x4xf32>, vector<2x4xf32> -> vector<2x4xf32>
    %c0_9 = arith.constant 0 : index
    %c0_10 = arith.constant 0 : index
    %12 = vector.load %arg5[%c0_9, %c0_10] : memref<1x4xf32, #tpu.memory_space<vmem>>, vector<1x4xf32>
    %13 = vector.broadcast %12 : vector<1x4xf32> to vector<2x4xf32>
    %14 = arith.addf %11, %13 : vector<2x4xf32>
    %c0_11 = arith.constant 0 : index
    %c0_12 = arith.constant 0 : index
    %15 = vector.load %arg6[%c0_11, %c0_12] : memref<256x4xf32, #tpu.memory_space<vmem>>, vector<256x4xf32>
    %cst_13 = arith.constant dense<0.000000e+00> : vector<2x4xf32>
    %16 = tpu.matmul %9, %15, %cst_13 {dimension_numbers = #tpu.dot_dimension_numbers<[1], [0], [0], [1], [0, 0, 1, 1], [], []>} : vector<2x256xf32>, vector<256x4xf32>, vector<2x4xf32> -> vector<2x4xf32>
    %c0_14 = arith.constant 0 : index
    %c0_15 = arith.constant 0 : index
    %17 = vector.load %arg7[%c0_14, %c0_15] : memref<1x4xf32, #tpu.memory_space<vmem>>, vector<1x4xf32>
    %18 = vector.broadcast %17 : vector<1x4xf32> to vector<2x4xf32>
    %19 = arith.addf %16, %18 : vector<2x4xf32>
    %c0_16 = arith.constant 0 : index
    %c0_17 = arith.constant 0 : index
    %20 = vector.load %arg8[%c0_16, %c0_17] : memref<2x4xf32, #tpu.memory_space<vmem>>, vector<2x4xf32>
    tpu.vector_store %arg8[%c0_16, %c0_17], %14 {strides = array<i32>} : memref<2x4xf32, #tpu.memory_space<vmem>>, vector<2x4xf32>,
    %c0_18 = arith.constant 0 : index
    %c0_19 = arith.constant 0 : index
    %21 = vector.load %arg9[%c0_18, %c0_19] : memref<2x4xf32, #tpu.memory_space<vmem>>, vector<2x4xf32>
    tpu.vector_store %arg9[%c0_18, %c0_19], %19 {strides = array<i32>} : memref<2x4xf32, #tpu.memory_space<vmem>>, vector<2x4xf32>,
    return
  }
  func.func @transform_0(%arg0: i32) -> (i32, i32) {
    %c0_i32 = arith.constant 0 : i32
    %c0_i32_0 = arith.constant 0 : i32
    return %arg0, %c0_i32 : i32, i32
  }
  func.func @transform_1(%arg0: i32) -> (i32, i32) {
    %c0_i32 = arith.constant 0 : i32
    %c0_i32_0 = arith.constant 0 : i32
    %c0_i32_1 = arith.constant 0 : i32
    return %c0_i32, %c0_i32_0 : i32, i32
  }
  func.func @transform_2(%arg0: i32) -> (i32, i32) {
    %c0_i32 = arith.constant 0 : i32
    %c0_i32_0 = arith.constant 0 : i32
    %c0_i32_1 = arith.constant 0 : i32
    return %c0_i32, %c0_i32_0 : i32, i32
  }
  func.func @transform_3(%arg0: i32) -> (i32, i32) {
    %c0_i32 = arith.constant 0 : i32
    %c0_i32_0 = arith.constant 0 : i32
    %c0_i32_1 = arith.constant 0 : i32
    return %c0_i32, %c0_i32_0 : i32, i32
  }
  func.func @transform_4(%arg0: i32) -> (i32, i32) {
    %c0_i32 = arith.constant 0 : i32
    %c0_i32_0 = arith.constant 0 : i32
    %c0_i32_1 = arith.constant 0 : i32
    return %c0_i32, %c0_i32_0 : i32, i32
  }
  func.func @transform_5(%arg0: i32) -> (i32, i32) {
    %c0_i32 = arith.constant 0 : i32
    %c0_i32_0 = arith.constant 0 : i32
    %c0_i32_1 = arith.constant 0 : i32
    return %c0_i32, %c0_i32_0 : i32, i32
  }
  func.func @transform_6(%arg0: i32) -> (i32, i32) {
    %c0_i32 = arith.constant 0 : i32
    %c0_i32_0 = arith.constant 0 : i32
    %c0_i32_1 = arith.constant 0 : i32
    return %c0_i32, %c0_i32_0 : i32, i32
  }
  func.func @transform_7(%arg0: i32) -> (i32, i32) {
    %c0_i32 = arith.constant 0 : i32
    %c0_i32_0 = arith.constant 0 : i32
    return %arg0, %c0_i32 : i32, i32
  }
  func.func @transform_8(%arg0: i32) -> (i32, i32) {
    %c0_i32 = arith.constant 0 : i32
    %c0_i32_0 = arith.constant 0 : i32
    return %arg0, %c0_i32 : i32, i32
  }
}

</mosaic_0001>

<bundles_post_ra>
// kernel: tpu_custom_call.1
= control target key start
LH: loop header
LB: loop body
LE: loop exit
PB: predicated region body
PF: predicated region fallthrough
CT: control target
= control target key end

     0   :  { %14 = vsyncpa [#allocation3], 0  ;;  %s1242_s0 = inlined_call_operand.vmem [shape: f32[2,256], index: 0, kind: input, shape index: {}]   ;;  %s1243_s1 = inlined_call_operand.hbm [shape: f32[256,512], index: 1, kind: input, shape index: {}]   ;;  %s1244_s2 = inlined_call_operand.vmem [shape: f32[1,512], index: 2, kind: input, shape index: {}]   ;;  %s1245_s3 = inlined_call_operand.vmem [shape: f32[256,4], index: 3, kind: input, shape index: {}]   ;;  %s1246_s4 = inlined_call_operand.vmem [shape: f32[1,4], index: 4, kind: input, shape index: {}]   ;;  %s1247_s5 = inlined_call_operand.vmem [shape: f32[256,4], index: 5, kind: input, shape index: {}]   ;;  %s1248_s6 = inlined_call_operand.vmem [shape: f32[1,4], index: 6, kind: input, shape index: {}]   ;;  %s1249_s7 = inlined_call_operand.hbm [shape: f32[2,4], index: 7, kind: output, shape index: {0}]   ;;  %s1250_s8 = inlined_call_operand.hbm [shape: f32[2,4], index: 8, kind: output, shape index: {1}]  }
   0x1   :  { %15 = vsyncpa [#allocation4], 0 }
   0x2   :  { %16 = vsyncpa [#allocation7], 0  ;;  %s944_s27 = smov [#allocation2]   ;;  %s872_s9 = scalar_lea.hbm %s1243_s1, 16384 }
   0x3   :  { %s24_s28 = sshll.u32 %s944_s27, 4  ;;  %p873_p0 = scmp.ne.s32.totalorder %s1243_s1, %s872_s9  ;;  %s25_s28 = int_to_ptr.vmem [resolvable:$true] %s24_s28 }
   0x4   :  { %p876_p1 = scmp.lt.u32.totalorder %s872_s9, %s1243_s1 }
   0x6   :  { %p878_p2 = pnand %p876_p1, %p873_p0 }
   0x8   :  { %881 = shalt.err (!%p878_p2)
}
   0x9   :  { %s882_s14 = scalar_lea.vmem %s25_s28, 16384  ;;  %p887_p4 = scmp.lt.s32.totalorder %s25_s28, %s25_s28 }
   0xa   :  { %p883_p3 = scmp.ne.s32.totalorder %s25_s28, %s882_s14  ;;  %p888_p5 = scmp.lt.s32.totalorder %s882_s14, %s882_s14 }
   0xc   :  { %p889_p6 = por %p888_p5, %p887_p4 }
   0xe   :  { %p890_p7 = pnand %p889_p6, %p883_p3 }
  0x10   :  { %893 = shalt.err (!%p890_p7)
}
  0x11   :  { %s945_s15 = smov 512   ;;  %s946_s16 = smov 32  }
  0x12   :  { %30 = dma.hbm_to_vmem [thread:$0]  %s1243_s1, 16384, %s25_s28, [#allocation3], %s945_s15, %s945_s15, %s946_s16  }
  0x13   :  { %938 = dma.done.wait [#allocation3], 16384  }
  0x14   :  { %939 = vsyncadd [#allocation3], 4294950912  ;;  %v46_v0 = vld [vmem:[#allocation2 + $0x8] sm:$0xff]  ;;  %v48_v2 = vld [vmem:[#allocation2 + $0x18] sm:$0xff]  ;;  %s947_s28 = smov [#allocation5]   ;;  %s948_s10 = smov [#allocation6]  }
  0x15   :  { %v50_v1 = vld [vmem:[#allocation2 + $0x28] sm:$0xff]  ;;  %v52_v4 = vld [vmem:[#allocation2 + $0x38] sm:$0xff]  ;;  %v45_v5 = vld [vmem:[#allocation2] sm:$0xff]  ;;  %s579_s29 = sshll.u32 %s947_s28, 4  ;;  %s589_s11 = sshll.u32 %s948_s10, 4  ;;  %vm570_vm0 = vcmask 25600   ;;  %s580_s29 = int_to_ptr.vmem [resolvable:$true] %s579_s29  ;;  %s590_s11 = int_to_ptr.vmem [resolvable:$true] %s589_s11 }
  0x16   :  { %v675_v3 = vpack.c.bf16 %v50_v1, %v46_v0  ;;  %v49_v6 = vld [vmem:[#allocation2 + $0x20] sm:$0xff]  ;;  %v739_v7 = vpack.c.bf16 %v52_v4, %v48_v2  ;;  %v47_v9 = vld [vmem:[#allocation2 + $0x10] sm:$0xff]  ;;  %v54_v11 = vld [vmem:[#allocation2 + $0x48] sm:$0xff]  ;;  %p899_p9 = scmp.lt.s32.totalorder %s580_s29, %s580_s29 }
  0x17   :  { %v677_v8 = vpack.c.bf16 %v49_v6, %v45_v5  ;;  %v51_v10 = vld [vmem:[#allocation2 + $0x30] sm:$0xff]  ;;  %v58_v13 = vld [vmem:[#allocation2 + $0x68] sm:$0xff]  ;;  %v56_v14 = vld [vmem:[#allocation2 + $0x58] sm:$0xff] }
  0x18   :  { %676 = vmatprep.subr.bf16.mxu0 %v675_v3  ;;  %v741_v12 = vpack.c.bf16 %v51_v10, %v47_v9  ;;  %v60_v15 = vld [vmem:[#allocation2 + $0x78] sm:$0xff]  ;;  %740 = vmatprep.subr.bf16.mxu1 %v739_v7  ;;  %v679_v16 = vpack.c.bf16 %v58_v13, %v54_v11  ;;  %v53_v18 = vld [vmem:[#allocation2 + $0x40] sm:$0xff]  ;;  %v55_v20 = vld [vmem:[#allocation2 + $0x50] sm:$0xff] }
  0x19   :  { %678 = vmatpush1.bf16.msra.mxu0 %v677_v8  ;;  %v743_v17 = vpack.c.bf16 %v60_v15, %v56_v14  ;;  %v57_v19 = vld [vmem:[#allocation2 + $0x60] sm:$0xff]  ;;  %v59_v22 = vld [vmem:[#allocation2 + $0x70] sm:$0xff]  ;;  %v62_v23 = vld [vmem:[#allocation2 + $0x88] sm:$0xff] }
  0x1a   :  { %742 = vmatpush1.bf16.msra.mxu1 %v741_v12  ;;  %v681_v21 = vpack.c.bf16 %v57_v19, %v53_v18  ;;  %v66_v24 = vld [vmem:[#allocation2 + $0xa8] sm:$0xff]  ;;  %680 = vmatprep.subr.bf16.mxu0 %v679_v16  ;;  %v745_v25 = vpack.c.bf16 %v59_v22, %v55_v20  ;;  %v64_v27 = vld [vmem:[#allocation2 + $0x98] sm:$0xff]  ;;  %v61_v29 = vld [vmem:[#allocation2 + $0x80] sm:$0xff] }
  0x1b   :  { %744 = vmatprep.subr.bf16.mxu1 %v743_v17  ;;  %v683_v26 = vpack.c.bf16 %v66_v24, %v62_v23  ;;  %v68_v28 = vld [vmem:[#allocation2 + $0xb8] sm:$0xff]  ;;  %v65_v31 = vld [vmem:[#allocation2 + $0xa0] sm:$0xff]  ;;  %v63_v32 = vld [vmem:[#allocation2 + $0x90] sm:$0xff] }
  0x1c   :  { %v747_v30 = vpack.c.bf16 %v68_v28, %v64_v27  ;;  %v67_v33 = vld [vmem:[#allocation2 + $0xb0] sm:$0xff]  ;;  %v685_v34 = vpack.c.bf16 %v65_v31, %v61_v29  ;;  %v70_v35 = vld [vmem:[#allocation2 + $0xc8] sm:$0xff]  ;;  %v72_v37 = vld [vmem:[#allocation2 + $0xd8] sm:$0xff] }
  0x1d   :  { %682 = vmatpush1.bf16.msra.mxu0 %v681_v21  ;;  %v74_v36 = vld [vmem:[#allocation2 + $0xe8] sm:$0xff]  ;;  %v749_v38 = vpack.c.bf16 %v67_v33, %v63_v32  ;;  %v76_v40 = vld [vmem:[#allocation2 + $0xf8] sm:$0xff]  ;;  %v69_v41 = vld [vmem:[#allocation2 + $0xc0] sm:$0xff] }
  0x1e   :  { %746 = vmatpush1.bf16.msra.mxu1 %v745_v25  ;;  %684 = vmatprep.subr.bf16.mxu0 %v683_v26  ;;  %v687_v39 = vpack.c.bf16 %v74_v36, %v70_v35  ;;  %v73_v42 = vld [vmem:[#allocation2 + $0xe0] sm:$0xff]  ;;  %v751_v43 = vpack.c.bf16 %v76_v40, %v72_v37  ;;  %v71_v44 = vld [vmem:[#allocation2 + $0xd0] sm:$0xff]  ;;  %v78_v46 = vld [vmem:[#allocation2 + $0x108] sm:$0xff] }
  0x1f   :  { %748 = vmatprep.subr.bf16.mxu1 %v747_v30  ;;  %v75_v45 = vld [vmem:[#allocation2 + $0xf0] sm:$0xff]  ;;  %v82_v47 = vld [vmem:[#allocation2 + $0x128] sm:$0xff]  ;;  %v80_v48 = vld [vmem:[#allocation2 + $0x118] sm:$0xff]  ;;  %v689_v50 = vpack.c.bf16 %v73_v42, %v69_v41 }
  0x20   :  { %v84_v49 = vld [vmem:[#allocation2 + $0x138] sm:$0xff]  ;;  %v753_v51 = vpack.c.bf16 %v75_v45, %v71_v44  ;;  %v691_v52 = vpack.c.bf16 %v82_v47, %v78_v46  ;;  %v77_v53 = vld [vmem:[#allocation2 + $0x100] sm:$0xff]  ;;  %v79_v55 = vld [vmem:[#allocation2 + $0x110] sm:$0xff] }
  0x21   :  { %686 = vmatpush1.bf16.msra.mxu0 %v685_v34  ;;  %v81_v54 = vld [vmem:[#allocation2 + $0x120] sm:$0xff]  ;;  %v755_v56 = vpack.c.bf16 %v84_v49, %v80_v48  ;;  %v83_v57 = vld [vmem:[#allocation2 + $0x130] sm:$0xff]  ;;  %v86_v58 = vld [vmem:[#allocation2 + $0x148] sm:$0xff] }
  0x22   :  { %750 = vmatpush1.bf16.msra.mxu1 %v749_v38  ;;  %688 = vmatprep.subr.bf16.mxu0 %v687_v39  ;;  %v90_v59 = vld [vmem:[#allocation2 + $0x168] sm:$0xff]  ;;  %v88_v60 = vld [vmem:[#allocation2 + $0x158] sm:$0xff]  ;;  %v693_v62 = vpack.c.bf16 %v81_v54, %v77_v53  ;;  %v757_v63 = vpack.c.bf16 %v83_v57, %v79_v55  ;;  %v85_v1 = vld [vmem:[#allocation2 + $0x140] sm:$0xff] }
  0x23   :  { %752 = vmatprep.subr.bf16.mxu1 %v751_v43  ;;  %v92_v61 = vld [vmem:[#allocation2 + $0x178] sm:$0xff]  ;;  %v695_v0 = vpack.c.bf16 %v90_v59, %v86_v58  ;;  %v89_v2 = vld [vmem:[#allocation2 + $0x160] sm:$0xff]  ;;  %v87_v3 = vld [vmem:[#allocation2 + $0x150] sm:$0xff] }
  0x24   :  { %v759_v4 = vpack.c.bf16 %v92_v61, %v88_v60  ;;  %v91_v5 = vld [vmem:[#allocation2 + $0x170] sm:$0xff]  ;;  %v94_v6 = vld [vmem:[#allocation2 + $0x188] sm:$0xff]  ;;  %v96_v8 = vld [vmem:[#allocation2 + $0x198] sm:$0xff]  ;;  %v697_v10 = vpack.c.bf16 %v89_v2, %v85_v1 }
  0x25   :  { %690 = vmatpush1.bf16.msra.mxu0 %v689_v50  ;;  %v98_v7 = vld [vmem:[#allocation2 + $0x1a8] sm:$0xff]  ;;  %v100_v9 = vld [vmem:[#allocation2 + $0x1b8] sm:$0xff]  ;;  %v761_v11 = vpack.c.bf16 %v91_v5, %v87_v3  ;;  %v93_v13 = vld [vmem:[#allocation2 + $0x180] sm:$0xff] }
  0x26   :  { %754 = vmatpush1.bf16.msra.mxu1 %v753_v51  ;;  %692 = vmatprep.subr.bf16.mxu0 %v691_v52  ;;  %v699_v12 = vpack.c.bf16 %v98_v7, %v94_v6  ;;  %v97_v14 = vld [vmem:[#allocation2 + $0x1a0] sm:$0xff]  ;;  %v95_v15 = vld [vmem:[#allocation2 + $0x190] sm:$0xff]  ;;  %v763_v16 = vpack.c.bf16 %v100_v9, %v96_v8  ;;  %v102_v18 = vld [vmem:[#allocation2 + $0x1c8] sm:$0xff] }
  0x27   :  { %756 = vmatprep.subr.bf16.mxu1 %v755_v56  ;;  %v99_v17 = vld [vmem:[#allocation2 + $0x1b0] sm:$0xff]  ;;  %v106_v19 = vld [vmem:[#allocation2 + $0x1e8] sm:$0xff]  ;;  %v104_v20 = vld [vmem:[#allocation2 + $0x1d8] sm:$0xff]  ;;  %v701_v22 = vpack.c.bf16 %v97_v14, %v93_v13 }
  0x28   :  { %v108_v21 = vld [vmem:[#allocation2 + $0x1f8] sm:$0xff]  ;;  %v765_v23 = vpack.c.bf16 %v99_v17, %v95_v15  ;;  %v703_v24 = vpack.c.bf16 %v106_v19, %v102_v18  ;;  %v101_v25 = vld [vmem:[#allocation2 + $0x1c0] sm:$0xff]  ;;  %v103_v27 = vld [vmem:[#allocation2 + $0x1d0] sm:$0xff] }
  0x29   :  { %694 = vmatpush1.bf16.msra.mxu0 %v693_v62  ;;  %v105_v26 = vld [vmem:[#allocation2 + $0x1e0] sm:$0xff]  ;;  %v767_v28 = vpack.c.bf16 %v108_v21, %v104_v20  ;;  %v107_v29 = vld [vmem:[#allocation2 + $0x1f0] sm:$0xff]  ;;  %v110_v30 = vld [vmem:[#allocation2 + $0x208] sm:$0xff] }
  0x2a   :  { %758 = vmatpush1.bf16.msra.mxu1 %v757_v63  ;;  %696 = vmatprep.subr.bf16.mxu0 %v695_v0  ;;  %v114_v31 = vld [vmem:[#allocation2 + $0x228] sm:$0xff]  ;;  %v112_v32 = vld [vmem:[#allocation2 + $0x218] sm:$0xff]  ;;  %v705_v34 = vpack.c.bf16 %v105_v26, %v101_v25  ;;  %v769_v35 = vpack.c.bf16 %v107_v29, %v103_v27  ;;  %v109_v37 = vld [vmem:[#allocation2 + $0x200] sm:$0xff] }
  0x2b   :  { %760 = vmatprep.subr.bf16.mxu1 %v759_v4  ;;  %v116_v33 = vld [vmem:[#allocation2 + $0x238] sm:$0xff]  ;;  %v707_v36 = vpack.c.bf16 %v114_v31, %v110_v30  ;;  %v113_v38 = vld [vmem:[#allocation2 + $0x220] sm:$0xff]  ;;  %v111_v39 = vld [vmem:[#allocation2 + $0x210] sm:$0xff] }
  0x2c   :  { %v771_v40 = vpack.c.bf16 %v116_v33, %v112_v32  ;;  %v115_v41 = vld [vmem:[#allocation2 + $0x230] sm:$0xff]  ;;  %v118_v42 = vld [vmem:[#allocation2 + $0x248] sm:$0xff]  ;;  %v120_v44 = vld [vmem:[#allocation2 + $0x258] sm:$0xff]  ;;  %v709_v46 = vpack.c.bf16 %v113_v38, %v109_v37 }
  0x2d   :  { %698 = vmatpush1.bf16.msra.mxu0 %v697_v10  ;;  %v122_v43 = vld [vmem:[#allocation2 + $0x268] sm:$0xff]  ;;  %v124_v45 = vld [vmem:[#allocation2 + $0x278] sm:$0xff]  ;;  %v773_v47 = vpack.c.bf16 %v115_v41, %v111_v39  ;;  %v117_v49 = vld [vmem:[#allocation2 + $0x240] sm:$0xff] }
  0x2e   :  { %762 = vmatpush1.bf16.msra.mxu1 %v761_v11  ;;  %700 = vmatprep.subr.bf16.mxu0 %v699_v12  ;;  %v711_v48 = vpack.c.bf16 %v122_v43, %v118_v42  ;;  %v121_v50 = vld [vmem:[#allocation2 + $0x260] sm:$0xff]  ;;  %v119_v51 = vld [vmem:[#allocation2 + $0x250] sm:$0xff]  ;;  %v775_v52 = vpack.c.bf16 %v124_v45, %v120_v44  ;;  %v126_v54 = vld [vmem:[#allocation2 + $0x288] sm:$0xff] }
  0x2f   :  { %764 = vmatprep.subr.bf16.mxu1 %v763_v16  ;;  %v123_v53 = vld [vmem:[#allocation2 + $0x270] sm:$0xff]  ;;  %v130_v55 = vld [vmem:[#allocation2 + $0x2a8] sm:$0xff]  ;;  %v128_v56 = vld [vmem:[#allocation2 + $0x298] sm:$0xff]  ;;  %v713_v58 = vpack.c.bf16 %v121_v50, %v117_v49 }
  0x30   :  { %v132_v57 = vld [vmem:[#allocation2 + $0x2b8] sm:$0xff]  ;;  %v777_v59 = vpack.c.bf16 %v123_v53, %v119_v51  ;;  %v715_v60 = vpack.c.bf16 %v130_v55, %v126_v54  ;;  %v125_v61 = vld [vmem:[#allocation2 + $0x280] sm:$0xff]  ;;  %v127_v63 = vld [vmem:[#allocation2 + $0x290] sm:$0xff] }
  0x31   :  { %702 = vmatpush1.bf16.msra.mxu0 %v701_v22  ;;  %v129_v62 = vld [vmem:[#allocation2 + $0x2a0] sm:$0xff]  ;;  %v779_v0 = vpack.c.bf16 %v132_v57, %v128_v56  ;;  %v131_v1 = vld [vmem:[#allocation2 + $0x2b0] sm:$0xff]  ;;  %v134_v2 = vld [vmem:[#allocation2 + $0x2c8] sm:$0xff] }
  0x32   :  { %766 = vmatpush1.bf16.msra.mxu1 %v765_v23  ;;  %704 = vmatprep.subr.bf16.mxu0 %v703_v24  ;;  %v138_v3 = vld [vmem:[#allocation2 + $0x2e8] sm:$0xff]  ;;  %v136_v4 = vld [vmem:[#allocation2 + $0x2d8] sm:$0xff]  ;;  %v717_v6 = vpack.c.bf16 %v129_v62, %v125_v61  ;;  %v133_v7 = vld [vmem:[#allocation2 + $0x2c0] sm:$0xff]  ;;  %v781_v8 = vpack.c.bf16 %v131_v1, %v127_v63 }
  0x33   :  { %768 = vmatprep.subr.bf16.mxu1 %v767_v28  ;;  %v140_v5 = vld [vmem:[#allocation2 + $0x2f8] sm:$0xff]  ;;  %v719_v9 = vpack.c.bf16 %v138_v3, %v134_v2  ;;  %v137_v10 = vld [vmem:[#allocation2 + $0x2e0] sm:$0xff]  ;;  %v135_v11 = vld [vmem:[#allocation2 + $0x2d0] sm:$0xff] }
  0x34   :  { %v139_v12 = vld [vmem:[#allocation2 + $0x2f0] sm:$0xff]  ;;  %v783_v13 = vpack.c.bf16 %v140_v5, %v136_v4  ;;  %v142_v14 = vld [vmem:[#allocation2 + $0x308] sm:$0xff]  ;;  %v1009_v16 = vld.sshfl [vmem:[%s1242_s0] sm:$0x33 pattern:$0x76325410]  ;;  %v721_v20 = vpack.c.bf16 %v137_v10, %v133_v7 }
  0x35   :  { %706 = vmatpush1.bf16.msra.mxu0 %v705_v34  ;;  %v146_v15 = vld [vmem:[#allocation2 + $0x328] sm:$0xff]  ;;  %v144_v17 = vld [vmem:[#allocation2 + $0x318] sm:$0xff]  ;;  %v203_v19 = vcombine.high %v1009_v16, %v1009_v16  ;;  %v785_v21 = vpack.c.bf16 %v139_v12, %v135_v11  ;;  %v141_v23 = vld [vmem:[#allocation2 + $0x300] sm:$0xff] }
  0x36   :  { %770 = vmatpush1.bf16.msra.mxu1 %v769_v35  ;;  %708 = vmatprep.subr.bf16.mxu0 %v707_v36  ;;  %v148_v18 = vld [vmem:[#allocation2 + $0x338] sm:$0xff]  ;;  %v723_v22 = vpack.c.bf16 %v146_v15, %v142_v14  ;;  %v145_v24 = vld [vmem:[#allocation2 + $0x320] sm:$0xff]  ;;  %v143_v25 = vld [vmem:[#allocation2 + $0x310] sm:$0xff] }
  0x37   :  { %772 = vmatprep.subr.bf16.mxu1 %v771_v40  ;;  %v787_v26 = vpack.c.bf16 %v148_v18, %v144_v17  ;;  %v147_v27 = vld [vmem:[#allocation2 + $0x330] sm:$0xff]  ;;  %v150_v28 = vld [vmem:[#allocation2 + $0x348] sm:$0xff]  ;;  %270 = vmatprep.mubr.f32.mxu0 %v203_v19  ;;  %v152_v30 = vld [vmem:[#allocation2 + $0x358] sm:$0xff]  ;;  %v725_v32 = vpack.c.bf16 %v145_v24, %v141_v23 }
  0x38   :  { %v154_v29 = vld [vmem:[#allocation2 + $0x368] sm:$0xff]  ;;  %v156_v31 = vld [vmem:[#allocation2 + $0x378] sm:$0xff]  ;;  %341 = vmatprep.mubr.f32.mxu1 %v203_v19  ;;  %v789_v33 = vpack.c.bf16 %v147_v27, %v143_v25  ;;  %v149_v35 = vld [vmem:[#allocation2 + $0x340] sm:$0xff] }
  0x39   :  { %710 = vmatpush1.bf16.msra.mxu0 %v709_v46  ;;  %v727_v34 = vpack.c.bf16 %v154_v29, %v150_v28  ;;  %v153_v36 = vld [vmem:[#allocation2 + $0x360] sm:$0xff]  ;;  %v151_v37 = vld [vmem:[#allocation2 + $0x350] sm:$0xff]  ;;  %v791_v38 = vpack.c.bf16 %v156_v31, %v152_v30  ;;  %v158_v40 = vld [vmem:[#allocation2 + $0x388] sm:$0xff] }
  0x3a   :  { %774 = vmatpush1.bf16.msra.mxu1 %v773_v47  ;;  %712 = vmatprep.subr.bf16.mxu0 %v711_v48  ;;  %v155_v39 = vld [vmem:[#allocation2 + $0x370] sm:$0xff]  ;;  %v162_v41 = vld [vmem:[#allocation2 + $0x3a8] sm:$0xff]  ;;  %v160_v42 = vld [vmem:[#allocation2 + $0x398] sm:$0xff]  ;;  %v729_v44 = vpack.c.bf16 %v153_v36, %v149_v35 }
  0x3b   :  { %776 = vmatprep.subr.bf16.mxu1 %v775_v52  ;;  %v164_v43 = vld [vmem:[#allocation2 + $0x3b8] sm:$0xff]  ;;  %v793_v45 = vpack.c.bf16 %v155_v39, %v151_v37  ;;  %v731_v46 = vpack.c.bf16 %v162_v41, %v158_v40  ;;  %v157_v47 = vld [vmem:[#allocation2 + $0x380] sm:$0xff]  ;;  %v159_v49 = vld [vmem:[#allocation2 + $0x390] sm:$0xff] }
  0x3c   :  { %v161_v48 = vld [vmem:[#allocation2 + $0x3a0] sm:$0xff]  ;;  %v795_v50 = vpack.c.bf16 %v164_v43, %v160_v42  ;;  %v163_v51 = vld [vmem:[#allocation2 + $0x3b0] sm:$0xff]  ;;  %v166_v52 = vld [vmem:[#allocation2 + $0x3c8] sm:$0xff] }
  0x3d   :  { %714 = vmatpush1.bf16.msra.mxu0 %v713_v58  ;;  %v170_v53 = vld [vmem:[#allocation2 + $0x3e8] sm:$0xff]  ;;  %v168_v54 = vld [vmem:[#allocation2 + $0x3d8] sm:$0xff]  ;;  %v733_v56 = vpack.c.bf16 %v161_v48, %v157_v47  ;;  %v797_v57 = vpack.c.bf16 %v163_v51, %v159_v49  ;;  %v167_v61 = vld [vmem:[#allocation2 + $0x3d0] sm:$0xff] }
  0x3e   :  { %778 = vmatpush1.bf16.msra.mxu1 %v777_v59  ;;  %716 = vmatprep.subr.bf16.mxu0 %v715_v60  ;;  %v172_v55 = vld [vmem:[#allocation2 + $0x3f8] sm:$0xff]  ;;  %v735_v58 = vpack.c.bf16 %v170_v53, %v166_v52  ;;  %v165_v59 = vld [vmem:[#allocation2 + $0x3c0] sm:$0xff]  ;;  %v171_v63 = vld [vmem:[#allocation2 + $0x3f0] sm:$0xff] }
  0x3f   :  { %780 = vmatprep.subr.bf16.mxu1 %v779_v0  ;;  %v169_v60 = vld [vmem:[#allocation2 + $0x3e0] sm:$0xff]  ;;  %v799_v62 = vpack.c.bf16 %v172_v55, %v168_v54  ;;  %v369_v1 = vld [vmem:[%s1245_s3 + $0x88] sm:$0xff]  ;;  %v801_v5 = vpack.c.bf16 %v171_v63, %v167_v61  ;;  %v370_v12 = vld [vmem:[%s1245_s3 + $0x90] sm:$0xff] }
  0x40   :  { %v368_v0 = vld [vmem:[%s1245_s3 + $0x80] sm:$0xff]  ;;  %v478_v3 = vld [vmem:[%s1247_s5 + $0x88] sm:$0xff]  ;;  %v737_v4 = vpack.c.bf16 %v169_v60, %v165_v59  ;;  %v479_v14 = vld [vmem:[%s1247_s5 + $0x90] sm:$0xff] }
  0x41   :  { %718 = vmatpush1.bf16.msra.mxu0 %v717_v6  ;;  %v477_v2 = vld [vmem:[%s1247_s5 + $0x80] sm:$0xff]  ;;  %v803_v6 = vpack.c.bf16 %v369_v1, %v368_v0  ;;  %v462_v11 = vld [vmem:[%s1247_s5 + $0x8] sm:$0xff]  ;;  %v480_v15 = vld [vmem:[%s1247_s5 + $0x98] sm:$0xff] }
  0x42   :  { %782 = vmatpush1.bf16.msra.mxu1 %v781_v8  ;;  %720 = vmatprep.subr.bf16.mxu0 %v719_v9  ;;  %v352_v7 = vld [vmem:[%s1245_s3] sm:$0xff]  ;;  %v353_v8 = vld [vmem:[%s1245_s3 + $0x8] sm:$0xff]  ;;  %v835_v10 = vpack.c.bf16 %v478_v3, %v477_v2  ;;  %v839_v23 = vpack.c.bf16 %v480_v15, %v479_v14  ;;  %v464_v24 = vld [vmem:[%s1247_s5 + $0x18] sm:$0xff] }
  0x43   :  { %784 = vmatprep.subr.bf16.mxu1 %v783_v13  ;;  %v461_v9 = vld [vmem:[%s1247_s5] sm:$0xff]  ;;  %v371_v13 = vld [vmem:[%s1245_s3 + $0x98] sm:$0xff]  ;;  %v805_v17 = vpack.c.bf16 %v353_v8, %v352_v7  ;;  %v482_v28 = vld [vmem:[%s1247_s5 + $0xa8] sm:$0xff] }
  0x44   :  { %v837_v18 = vpack.c.bf16 %v462_v11, %v461_v9  ;;  %v807_v19 = vpack.c.bf16 %v371_v13, %v370_v12  ;;  %v372_v25 = vld [vmem:[%s1245_s3 + $0xa0] sm:$0xff]  ;;  %v466_v35 = vld [vmem:[%s1247_s5 + $0x28] sm:$0xff]  ;;  %v374_v36 = vld [vmem:[%s1245_s3 + $0xb0] sm:$0xff] }
  0x45   :  { %722 = vmatpush1.bf16.msra.mxu0 %v721_v20  ;;  %v354_v20 = vld [vmem:[%s1245_s3 + $0x10] sm:$0xff]  ;;  %v481_v27 = vld [vmem:[%s1247_s5 + $0xa0] sm:$0xff]  ;;  %v375_v37 = vld [vmem:[%s1245_s3 + $0xb8] sm:$0xff] }
  0x46   :  { %786 = vmatpush1.bf16.msra.mxu1 %v785_v21  ;;  %724 = vmatprep.subr.bf16.mxu0 %v723_v22  ;;  %v355_v21 = vld [vmem:[%s1245_s3 + $0x18] sm:$0xff]  ;;  %v463_v22 = vld [vmem:[%s1247_s5 + $0x10] sm:$0xff]  ;;  %v815_v42 = vpack.c.bf16 %v375_v37, %v374_v36  ;;  %v376_v48 = vld [vmem:[%s1245_s3 + $0xc0] sm:$0xff] }
  0x47   :  { %788 = vmatprep.subr.bf16.mxu1 %v787_v26  ;;  %v373_v26 = vld [vmem:[%s1245_s3 + $0xa8] sm:$0xff]  ;;  %v809_v29 = vpack.c.bf16 %v355_v21, %v354_v20  ;;  %v841_v30 = vpack.c.bf16 %v464_v24, %v463_v22  ;;  %v484_v39 = vld [vmem:[%s1247_s5 + $0xb8] sm:$0xff]  ;;  %v358_v43 = vld [vmem:[%s1245_s3 + $0x30] sm:$0xff] }
  0x48   :  { %v811_v31 = vpack.c.bf16 %v373_v26, %v372_v25  ;;  %v468_v47 = vld [vmem:[%s1247_s5 + $0x38] sm:$0xff]  ;;  %v377_v49 = vld [vmem:[%s1245_s3 + $0xc8] sm:$0xff]  ;;  %v360_v55 = vld [vmem:[%s1245_s3 + $0x40] sm:$0xff] }
  0x49   :  { %726 = vmatpush1.bf16.msra.mxu0 %v725_v32  ;;  %v356_v32 = vld [vmem:[%s1245_s3 + $0x20] sm:$0xff]  ;;  %v486_v51 = vld [vmem:[%s1247_s5 + $0xc8] sm:$0xff]  ;;  %v819_v54 = vpack.c.bf16 %v377_v49, %v376_v48  ;;  %v378_v60 = vld [vmem:[%s1245_s3 + $0xd0] sm:$0xff] }
  0x4a   :  { %790 = vmatpush1.bf16.msra.mxu1 %v789_v33  ;;  %728 = vmatprep.subr.bf16.mxu0 %v727_v34  ;;  %v357_v33 = vld [vmem:[%s1245_s3 + $0x28] sm:$0xff]  ;;  %v465_v34 = vld [vmem:[%s1247_s5 + $0x20] sm:$0xff]  ;;  %v379_v61 = vld [vmem:[%s1245_s3 + $0xd8] sm:$0xff] }
  0x4b   :  { %792 = vmatprep.subr.bf16.mxu1 %v791_v38  ;;  %v483_v38 = vld [vmem:[%s1247_s5 + $0xb0] sm:$0xff]  ;;  %v813_v40 = vpack.c.bf16 %v357_v33, %v356_v32  ;;  %v845_v41 = vpack.c.bf16 %v466_v35, %v465_v34  ;;  %v470_v59 = vld [vmem:[%s1247_s5 + $0x48] sm:$0xff]  ;;  %v488_v63 = vld [vmem:[%s1247_s5 + $0xd8] sm:$0xff]  ;;  %v823_v2 = vpack.c.bf16 %v379_v61, %v378_v60 }
  0x4c   :  { %v362_v3 = vld [vmem:[%s1245_s3 + $0x50] sm:$0xff]  ;;  %v472_v7 = vld [vmem:[%s1247_s5 + $0x58] sm:$0xff]  ;;  %v380_v8 = vld [vmem:[%s1245_s3 + $0xe0] sm:$0xff] }
  0x4d   :  { %730 = vmatpush1.bf16.msra.mxu0 %v729_v44  ;;  %v359_v44 = vld [vmem:[%s1245_s3 + $0x38] sm:$0xff]  ;;  %v381_v9 = vld [vmem:[%s1245_s3 + $0xe8] sm:$0xff]  ;;  %v491_v25 = vld [vmem:[%s1247_s5 + $0xf0] sm:$0xff] }
  0x4e   :  { %794 = vmatpush1.bf16.msra.mxu1 %v793_v45  ;;  %732 = vmatprep.subr.bf16.mxu0 %v731_v46  ;;  %v467_v45 = vld [vmem:[%s1247_s5 + $0x30] sm:$0xff]  ;;  %v847_v46 = vpack.c.bf16 %v484_v39, %v483_v38  ;;  %v817_v52 = vpack.c.bf16 %v359_v44, %v358_v43  ;;  %v490_v11 = vld [vmem:[%s1247_s5 + $0xe8] sm:$0xff]  ;;  %v827_v14 = vpack.c.bf16 %v381_v9, %v380_v8  ;;  %v383_v24 = vld [vmem:[%s1245_s3 + $0xf8] sm:$0xff] }
  0x4f   :  { %796 = vmatprep.subr.bf16.mxu1 %v795_v50  ;;  %v485_v50 = vld [vmem:[%s1247_s5 + $0xc0] sm:$0xff]  ;;  %v849_v53 = vpack.c.bf16 %v468_v47, %v467_v45  ;;  %v474_v21 = vld [vmem:[%s1247_s5 + $0x68] sm:$0xff]  ;;  %v475_v32 = vld [vmem:[%s1247_s5 + $0x70] sm:$0xff] }
  0x50   :  { %v476_v33 = vld [vmem:[%s1247_s5 + $0x78] sm:$0xff]  ;;  %v173_v37 = vld [vmem:[%s1244_s2] sm:$0xf] }
  0x51   :  { %734 = vmatpush1.bf16.msra.mxu0 %v733_v56  ;;  %v361_v56 = vld [vmem:[%s1245_s3 + $0x48] sm:$0xff]  ;;  %v865_v34 = vpack.c.bf16 %v476_v33, %v475_v32 }
  0x52   :  { %798 = vmatpush1.bf16.msra.mxu1 %v797_v57  ;;  %736 = vmatprep.subr.bf16.mxu0 %v735_v58  ;;  %v469_v57 = vld [vmem:[%s1247_s5 + $0x40] sm:$0xff]  ;;  %v851_v58 = vpack.c.bf16 %v486_v51, %v485_v50  ;;  %v821_v0 = vpack.c.bf16 %v361_v56, %v360_v55 }
  0x53   :  { %800 = vmatprep.subr.bf16.mxu1 %v799_v62  ;;  %v487_v62 = vld [vmem:[%s1247_s5 + $0xd0] sm:$0xff]  ;;  %v853_v1 = vpack.c.bf16 %v470_v59, %v469_v57  ;;  %v603_v59 = vld [vmem:[%s1246_s4] ss:$0 sm:$0xff]  ;;  %s894_s4 = scalar_lea.vmem %s580_s29, 32 }
  0x54   :  { %p895_p8 = scmp.ne.s32.totalorder %s580_s29, %s894_s4  ;;  %p900_p10 = scmp.lt.s32.totalorder %s894_s4, %s894_s4 }
  0x55   :  { %738 = vmatpush1.bf16.msra.mxu0 %v737_v4  ;;  %v363_v4 = vld [vmem:[%s1245_s3 + $0x58] sm:$0xff] }
  0x56   :  { %802 = vmatpush1.bf16.msra.mxu1 %v801_v5  ;;  %804 = vmatprep.subr.bf16.mxu0 %v803_v6  ;;  %v471_v5 = vld [vmem:[%s1247_s5 + $0x50] sm:$0xff]  ;;  %v855_v6 = vpack.c.bf16 %v488_v63, %v487_v62  ;;  %v825_v12 = vpack.c.bf16 %v363_v4, %v362_v3  ;;  %v604_v62 = vld [vmem:[%s1248_s6] ss:$0 sm:$0xff]  ;;  %p901_p11 = por %p900_p10, %p899_p9 }
  0x57   :  { %836 = vmatprep.subr.bf16.mxu1 %v835_v10  ;;  %v489_v10 = vld [vmem:[%s1247_s5 + $0xe0] sm:$0xff]  ;;  %v857_v13 = vpack.c.bf16 %v472_v7, %v471_v5 }
  0x58   :  { %271 = vmatmul.mubr.f32.vlgmr.msra.gmra.mrb[0].mxu0 %v1009_v16  ;;  %v859_v15 = vpack.c.bf16 %v490_v11, %v489_v10  ;;  %p902_p12 = pnand %p901_p11, %p895_p8 }
  0x59   :  { %342 = vmatmul.mubr.f32.vlgmr.msra.gmra.mrb[0].mxu1 %v1009_v16  ;;  %806 = vmatpush3.bf16.msra.mxu0 %v805_v17  ;;  %v843_v16 = vpack.c.bf16 %v482_v28, %v481_v27  ;;  %v364_v17 = vld [vmem:[%s1245_s3 + $0x60] sm:$0xff]  ;;  %v492_v27 = vld [vmem:[%s1247_s5 + $0xf8] sm:$0xff]  ;;  %v366_v28 = vld [vmem:[%s1245_s3 + $0x70] sm:$0xff] }
  0x5a   :  { %838 = vmatpush3.bf16.msra.mxu1 %v837_v18  ;;  %808 = vmatprep.subr.bf16.mxu0 %v807_v19  ;;  %v365_v18 = vld [vmem:[%s1245_s3 + $0x68] sm:$0xff]  ;;  %v473_v19 = vld [vmem:[%s1247_s5 + $0x60] sm:$0xff] }
  0x5b   :  { %840 = vmatprep.subr.bf16.mxu1 %v839_v23  ;;  %v829_v20 = vpack.c.bf16 %v365_v18, %v364_v17  ;;  %v861_v22 = vpack.c.bf16 %v474_v21, %v473_v19  ;;  %v382_v23 = vld [vmem:[%s1245_s3 + $0xf0] sm:$0xff] }
  0x5c   :  { %v831_v26 = vpack.c.bf16 %v383_v24, %v382_v23 }
  0x5d   :  { %810 = vmatpush3.bf16.msra.mxu0 %v809_v29  ;;  %v367_v29 = vld [vmem:[%s1245_s3 + $0x78] sm:$0xff] }
  0x5e   :  { %842 = vmatpush3.bf16.msra.mxu1 %v841_v30  ;;  %812 = vmatprep.subr.bf16.mxu0 %v811_v31  ;;  %v863_v30 = vpack.c.bf16 %v492_v27, %v491_v25  ;;  %v833_v31 = vpack.c.bf16 %v367_v29, %v366_v28 }
  0x5f   :  { %844 = vmatprep.subr.bf16.mxu1 %v843_v16  ;;  %v175_v16 = vlaneseq }
  0x61   :  { %814 = vmatpush3.bf16.msra.mxu0 %v813_v40  ;;  %v176_v35 = vshrl.u32 %v175_v16, 7 }
  0x62   :  { %846 = vmatpush3.bf16.msra.mxu1 %v845_v41  ;;  %816 = vmatprep.subr.bf16.mxu0 %v815_v42 }
  0x63   :  { %848 = vmatprep.subr.bf16.mxu1 %v847_v46  ;;  %v177_v36 = vsub.s32 0, %v176_v35  ;;  %v185_v38 = vsub.s32 2, %v176_v35  ;;  %v181_v39 = vsub.s32 1, %v176_v35  ;;  %v189_v40 = vsub.s32 3, %v176_v35 }
  0x65   :  { %818 = vmatpush3.bf16.msra.mxu0 %v817_v52  ;;  %v178_v41 = vrot.slane %v173_v37, %v177_v36  ;;  %v186_v42 = vrot.slane %v173_v37, %v185_v38  ;;  %v182_v43 = vrot.slane %v173_v37, %v181_v39  ;;  %v190_v44 = vrot.slane %v173_v37, %v189_v40 }
  0x66   :  { %850 = vmatpush3.bf16.msra.mxu1 %v849_v53  ;;  %820 = vmatprep.subr.bf16.mxu0 %v819_v54 }
  0x67   :  { %852 = vmatprep.subr.bf16.mxu1 %v851_v58 }
  0x69   :  { %822 = vmatpush3.bf16.msra.mxu0 %v821_v0 }
  0x6a   :  { %854 = vmatpush3.bf16.msra.mxu1 %v853_v1  ;;  %824 = vmatprep.subr.bf16.mxu0 %v823_v2 }
  0x6b   :  { %856 = vmatprep.subr.bf16.mxu1 %v855_v6 }
  0x6d   :  { %826 = vmatpush3.bf16.msra.mxu0 %v825_v12 }
  0x6e   :  { %858 = vmatpush3.bf16.msra.mxu1 %v857_v13  ;;  %828 = vmatprep.subr.bf16.mxu0 %v827_v14 }
  0x6f   :  { %860 = vmatprep.subr.bf16.mxu1 %v859_v15 }
  0x71   :  { %830 = vmatpush3.bf16.msra.mxu0 %v829_v20 }
  0x72   :  { %862 = vmatpush3.bf16.msra.mxu1 %v861_v22  ;;  %832 = vmatprep.subr.bf16.mxu0 %v831_v26 }
  0x73   :  { %864 = vmatprep.subr.bf16.mxu1 %v863_v30 }
  0x75   :  { %834 = vmatpush3.bf16.msra.mxu0 %v833_v31 }
  0x76   :  { %866 = vmatpush3.bf16.msra.mxu1 %v865_v34 }
 0x12b   :  { %v272_v45 = vpop.f32.mrb[0].mxu0 }
 0x12c   :  { %v273_v46 = vadd.f32 %v272_v45, %v178_v41  ;;  %v343_v47 = vpop.f32.mrb[0].mxu1  ;;  %v274_v48 = vpop.f32.mrb[1].mxu0 }
 0x12d   :  { %v344_v49 = vadd.f32 %v343_v47, %v186_v42  ;;  %v275_v50 = vadd.f32 %v274_v48, %v182_v43  ;;  %v345_v51 = vpop.f32.mrb[1].mxu1 }
 0x12e   :  { %v346_v52 = vadd.f32 %v345_v51, %v190_v44  ;;  %v348_v54 = vmax.f32 %v273_v46, 0.0 }
 0x12f   :  { %v349_v53 = vmax.f32 %v275_v50, 0.0  ;;  %v350_v56 = vmax.f32 %v344_v49, 0.0 }
 0x130   :  { %v351_v55 = vmax.f32 %v346_v52, 0.0 }
 0x131   :  { %455 = vmatprep.mubr.f32.mxu0 %v349_v53 }
 0x132   :  { %564 = vmatprep.mubr.f32.mxu1 %v351_v55  ;;  %456 = vmatmul.mubr.f32.vlgmr.msra.gmra.mrb[2].mxu0 %v348_v54 }
 0x133   :  { %565 = vmatmul.mubr.f32.vlgmr.msra.gmra.mrb[2].mxu1 %v350_v56 }
 0x205   :  { %v637_v57 = vpop.f32.mrb[2].mxu0 }
 0x206   :  { %v672_v58 = vpop.f32.mrb[2].mxu1  ;;  %v638_v60 = vpop.f32.mrb[3].mxu0 }
 0x207   :  { %v639_v61 = vadd.f32 %v638_v60, %v637_v57  ;;  %v673_v63 = vpop.f32.mrb[3].mxu1 }
 0x208   :  { %v674_v0 = vadd.f32 %v673_v63, %v672_v58 }
 0x209   :  { %v458_v1 = vadd.f32 %v639_v61, %v603_v59 }
 0x20a   :  { %v567_v2 = vadd.f32 %v674_v0, %v604_v62 }
 0x20b   :  { %571 = vst.msk [vmem:[#allocation5] sm:$0x3] %vm570_vm0, %v458_v1 }
 0x20c   :  { %905 = shalt.err (!%p902_p12)
}
 0x20d   :  { %s906_s13 = scalar_lea.hbm %s1249_s7, 32 }
 0x20e   :  { %p907_p13 = scmp.ne.s32.totalorder %s1249_s7, %s906_s13  ;;  %p910_p0 = scmp.lt.u32.totalorder %s906_s13, %s1249_s7 }
 0x210   :  { %p912_p1 = pnand %p910_p0, %p907_p13 }
 0x212   :  { %915 = shalt.err (!%p912_p1)
}
 0x213   :  { %582 = dma.vmem_to_hbm [thread:$0]  %s580_s29, 32, %s1249_s7, [#allocation4]   ;;  %572 = vst.msk [vmem:[#allocation6] sm:$0x3] %vm570_vm0, %v567_v2 }
 0x214   :  { %s916_s19 = scalar_lea.vmem %s590_s11, 32  ;;  %p921_p3 = scmp.lt.s32.totalorder %s590_s11, %s590_s11 }
 0x215   :  { %p917_p2 = scmp.ne.s32.totalorder %s590_s11, %s916_s19  ;;  %p922_p4 = scmp.lt.s32.totalorder %s916_s19, %s916_s19 }
 0x217   :  { %p923_p5 = por %p922_p4, %p921_p3 }
 0x219   :  { %p924_p6 = pnand %p923_p5, %p917_p2 }
 0x21b   :  { %927 = shalt.err (!%p924_p6)
}
 0x21c   :  { %s928_s21 = scalar_lea.hbm %s1250_s8, 32 }
 0x21d   :  { %p929_p7 = scmp.ne.s32.totalorder %s1250_s8, %s928_s21  ;;  %p932_p8 = scmp.lt.u32.totalorder %s928_s21, %s1250_s8 }
 0x21f   :  { %p934_p9 = pnand %p932_p8, %p929_p7 }
 0x221   :  { %937 = shalt.err (!%p934_p9)
}
 0x222   :  { %592 = dma.vmem_to_hbm [thread:$0]  %s590_s11, 32, %s1250_s8, [#allocation7]  }
 0x223   :  { %940 = dma.done.wait [#allocation4], 32  }
 0x224   :  { %941 = vsyncadd [#allocation4], 4294967264 }
 0x225   :  { %942 = dma.done.wait [#allocation7], 32  }
 0x226   :  { %943 = vsyncadd [#allocation7], 4294967264 }
 0x227   :  { %599 = vsyncpa [#allocation3], 1 }
 0x228   :  { %600 = vsyncpa [#allocation4], 1 }
 0x229   :  { %601 = vsyncpa [#allocation7], 1 }

</bundles_post_ra>
